<compile_context>
chip_gen: v7x
topology: tpu7x:2x2x1
jax: 0.10.0
libtpu: 0.0.40
codegen_flags: <defaults>
</compile_context>

<pallas_src>
import functools

import jax
import jax.numpy as jnp
from jax.experimental import pallas as pl
from jax.experimental.pallas import tpu as pltpu


# ~2 MiB per tile: in+out, double-buffered -> ~8 MiB VMEM, fits every TPU gen.
_TARGET_TILE_BYTES = 2 * 1024 * 1024
# Prefer the widest lane-dense slab (2048-8192 lanes) that divides the size.
_LANE_WIDTHS = (8192, 4096, 2048, 1024, 512, 256, 128)
# Lane width used when the element count is not a multiple of 128 (padded).
_PAD_LANE_WIDTH = 1024


def _copy_kernel(x_ref, o_ref):
    # Identity copy of the current (block_rows, lanes) tile.
    o_ref[...] = x_ref[...]


@functools.partial(jax.jit, donate_argnums=(0,))
def _pallas_identity_copy(flat2d):
    """Aliased, tiled identity copy of a lane-dense (rows, lanes) slab."""
    rows, lanes = flat2d.shape
    itemsize = jnp.dtype(flat2d.dtype).itemsize

    # Sublane packing multiple for the dtype (f32: 8, bf16: 16, int8/fp8: 32).
    sub = max(8, 32 // itemsize)

    # Pick block_rows so one tile is ~2 MiB, aligned to the sublane packing.
    block_rows = _TARGET_TILE_BYTES // (lanes * itemsize)
    block_rows = max(sub, (block_rows // sub) * sub)

    if rows <= block_rows:
        # Small slab: one full-extent block (exempt from the (8,128) rule).
        block = (rows, lanes)
        grid = (1,)
    else:
        # cdiv grid; Pallas masks the ragged last block if rows % block_rows.
        block = (block_rows, lanes)
        grid = (pl.cdiv(rows, block_rows),)

    index_map = lambda i: (i, 0)

    return pl.pallas_call(
        _copy_kernel,
        out_shape=jax.ShapeDtypeStruct((rows, lanes), flat2d.dtype),
        grid_spec=pltpu.PrefetchScalarGridSpec(
            num_scalar_prefetch=0,
            grid=grid,
            in_specs=[pl.BlockSpec(block, index_map)],
            out_specs=pl.BlockSpec(block, index_map),
        ),
        # Output reuses the input HBM buffer: no extra allocation, and the
        # write-back targets the same (donated) buffer.
        input_output_aliases={0: 0},
        compiler_params=pltpu.CompilerParams(
            dimension_semantics=("parallel",),
            vmem_limit_bytes=16 * 1024 * 1024,
        ),
        cost_estimate=pl.CostEstimate(
            flops=0,
            transcendentals=0,
            bytes_accessed=2 * rows * lanes * itemsize,
        ),
    )(flat2d)


def _lane_dense_2d(x):
    """Flatten `x` into a wide lane-dense (rows, lanes) slab.

    Returns (slab, n) where n is the true (unpadded) element count.
    """
    n = x.size
    flat = x.reshape(-1)
    if n % 128 == 0:
        lanes = next(w for w in _LANE_WIDTHS if n % w == 0)
        return flat.reshape(n // lanes, lanes), n
    # Unaligned tail: pad to a lane multiple so the hot path stays tiled
    # (never a single VMEM-busting full-array block).
    lanes = _PAD_LANE_WIDTH
    n_pad = ((n + lanes - 1) // lanes) * lanes
    flat = jnp.pad(flat, (0, n_pad - n))
    return flat.reshape(n_pad // lanes, lanes), n


def utility_layer_forward(x, output_size, settings, use_pallas=True):
    """JAX/Pallas equivalent of Utility_Layer.forward.

    settings['type'] == 'reshape' -> x reshaped to output_size
    settings['type'] == 'flatten' -> x flattened to 1-D
    """
    layer_type = settings["type"]
    if layer_type not in ("reshape", "flatten"):
        raise Exception("layer_type {} is not valid".format(layer_type))

    if not use_pallas:
        # Production path: reshape/flatten is metadata-only in XLA.
        flat = x.reshape(-1)
    else:
        slab, n = _lane_dense_2d(x)
        copied = _pallas_identity_copy(slab)
        flat = copied.reshape(-1)
        if flat.shape[0] != n:
            flat = flat[:n]

    if layer_type == "reshape":
        return flat.reshape(output_size)
    return flat  # 'flatten'


if __name__ == "__main__":
    key = jax.random.PRNGKey(0)
    k1, k2, k3 = jax.random.split(key, 3)

    # --- Primary test: small NCHW input, matches the module's usage. ---
    x = jax.random.normal(k1, (2, 4, 16, 16), dtype=jnp.float32)
    ref_reshape = jnp.reshape(x, (2, 1024))
    ref_flatten = jnp.reshape(x, (-1,))

    out_reshape = utility_layer_forward(x, (2, 1024), {"type": "reshape"})
    out_reshape = jax.block_until_ready(out_reshape)
    assert out_reshape.shape == (2, 1024)
    assert jnp.array_equal(out_reshape, ref_reshape)

    out_flatten = utility_layer_forward(x, None, {"type": "flatten"})
    out_flatten = jax.block_until_ready(out_flatten)
    assert out_flatten.shape == (2 * 4 * 16 * 16,)
    assert jnp.array_equal(out_flatten, ref_flatten)

    # --- Unaligned element count (exercises the padded fallback path). ---
    x2 = jax.random.normal(k2, (3, 5, 7), dtype=jnp.float32)
    ref2 = jnp.reshape(x2, (-1,))
    out2 = utility_layer_forward(x2, None, {"type": "flatten"})
    out2 = jax.block_until_ready(out2)
    assert out2.shape == (105,)
    assert jnp.array_equal(out2, ref2)

    # --- Multi-block grid with a ragged last block (cdiv path). ---
    x3 = jax.random.normal(k3, (72, 64, 128), dtype=jnp.float32)
    ref3 = jnp.reshape(x3, (144, 4096))
    out3 = utility_layer_forward(x3, (144, 4096), {"type": "reshape"})
    out3 = jax.block_until_ready(out3)
    assert out3.shape == (144, 4096)
    assert jnp.array_equal(out3, ref3)

    print("KERNEL_OK")
</pallas_src>

<mosaic_0001>
module attributes {stable_mosaic.version = 11 : i64} {
  func.func @_copy_kernel(%arg0: i32, %arg1: memref<1x2048xf32, #tpu.memory_space<vmem>>, %arg2: memref<1x2048xf32, #tpu.memory_space<vmem>>) attributes {dimension_semantics = [#tpu.dimension_semantics<parallel>], iteration_bounds = array<i64: 1>, scalar_prefetch = 0 : i64, scratch_operands = 0 : i64, tpu.core_type = #tpu.core_type<tc>, window_params = [{transform_indices = @transform_0, window_bounds = array<i64: 1, 2048>}, {transform_indices = @transform_1, window_bounds = array<i64: 1, 2048>}]} {
    %c0 = arith.constant 0 : index
    %c0_0 = arith.constant 0 : index
    %0 = vector.load %arg1[%c0, %c0_0] : memref<1x2048xf32, #tpu.memory_space<vmem>>, vector<1x2048xf32>
    %c0_1 = arith.constant 0 : index
    %c0_2 = arith.constant 0 : index
    %1 = vector.load %arg2[%c0_1, %c0_2] : memref<1x2048xf32, #tpu.memory_space<vmem>>, vector<1x2048xf32>
    tpu.vector_store %arg2[%c0_1, %c0_2], %0 {strides = array<i32>} : memref<1x2048xf32, #tpu.memory_space<vmem>>, vector<1x2048xf32>,
    return
  }
  func.func @transform_0(%arg0: i32) -> (i32, i32) {
    %c0_i32 = arith.constant 0 : i32
    %c0_i32_0 = arith.constant 0 : i32
    return %arg0, %c0_i32 : i32, i32
  }
  func.func @transform_1(%arg0: i32) -> (i32, i32) {
    %c0_i32 = arith.constant 0 : i32
    %c0_i32_0 = arith.constant 0 : i32
    return %arg0, %c0_i32 : i32, i32
  }
}

</mosaic_0001>

<bundles_post_ra>
// kernel: _pallas_identity_copy.1
= control target key start
LH: loop header
LB: loop body
LE: loop exit
PB: predicated region body
PF: predicated region fallthrough
CT: control target
= control target key end

     0   :  { %6 = vsyncpa [#allocation3], 0  ;;  %s126_s0 = inlined_call_operand.hbm [shape: f32[1,2048], index: 0, kind: input, shape index: {}, may-alias: {0,1}]   ;;  %s127_s1 = inlined_call_operand.hbm [shape: f32[1,2048], index: 1, kind: output, shape index: {}, may-alias: {0,1}]  }
   0x1   :  { %7 = vsyncpa [#allocation4], 0  ;;  %s90_s6 = smov [#allocation2]   ;;  %s42_s10 = scalar_lea.hbm %s126_s0, 256 }
   0x2   :  { %s14_s7 = sshll.u32 %s90_s6, 4  ;;  %p43_p0 = scmp.ne.s32.totalorder %s126_s0, %s42_s10  ;;  %s15_s7 = int_to_ptr.vmem [resolvable:$true] %s14_s7 }
   0x3   :  { %p46_p1 = scmp.lt.u32.totalorder %s42_s10, %s126_s0 }
   0x5   :  { %p48_p2 = pnand %p46_p1, %p43_p0 }
   0x7   :  { %51 = shalt.err (!%p48_p2)
}
   0x8   :  { %s52_s15 = scalar_lea.vmem %s15_s7, 256  ;;  %p57_p4 = scmp.lt.s32.totalorder %s15_s7, %s15_s7 }
   0x9   :  { %p53_p3 = scmp.ne.s32.totalorder %s15_s7, %s52_s15  ;;  %p58_p5 = scmp.lt.s32.totalorder %s52_s15, %s52_s15 }
   0xb   :  { %p59_p6 = por %p58_p5, %p57_p4 }
   0xd   :  { %p60_p7 = pnand %p59_p6, %p53_p3 }
   0xf   :  { %63 = shalt.err (!%p60_p7)
}
  0x10   :  { %17 = dma.hbm_to_vmem [thread:$0]  %s126_s0, 256, %s15_s7, [#allocation3]  }
  0x11   :  { %86 = dma.done.wait [#allocation3], 256  }
  0x12   :  { %87 = vsyncadd [#allocation3], 4294967040  ;;  %s91_s18 = smov [#allocation5]   ;;  %v21_v0 = vld [vmem:[#allocation2] sm:$0xff]  ;;  %v22_v1 = vld [vmem:[#allocation2 + $0x8] sm:$0xff] }
  0x13   :  { %s31_s19 = sshll.u32 %s91_s18, 4  ;;  %23 = vst [vmem:[#allocation5] sm:$0xff] %v21_v0  ;;  %24 = vst [vmem:[#allocation5 + $0x8] sm:$0xff] %v22_v1  ;;  %s32_s19 = int_to_ptr.vmem [resolvable:$true] %s31_s19 }
  0x14   :  { %s64_s20 = scalar_lea.vmem %s32_s19, 256  ;;  %p69_p9 = scmp.lt.s32.totalorder %s32_s19, %s32_s19 }
  0x15   :  { %p65_p8 = scmp.ne.s32.totalorder %s32_s19, %s64_s20  ;;  %p70_p10 = scmp.lt.s32.totalorder %s64_s20, %s64_s20 }
  0x17   :  { %p71_p11 = por %p70_p10, %p69_p9 }
  0x19   :  { %p72_p12 = pnand %p71_p11, %p65_p8 }
  0x1b   :  { %75 = shalt.err (!%p72_p12)
}
  0x1c   :  { %s76_s0 = scalar_lea.hbm %s127_s1, 256 }
  0x1d   :  { %p77_p13 = scmp.ne.s32.totalorder %s127_s1, %s76_s0  ;;  %p80_p0 = scmp.lt.u32.totalorder %s76_s0, %s127_s1 }
  0x1f   :  { %p82_p1 = pnand %p80_p0, %p77_p13 }
  0x21   :  { %85 = shalt.err (!%p82_p1)
}
  0x22   :  { %34 = dma.vmem_to_hbm [thread:$0]  %s32_s19, 256, %s127_s1, [#allocation4]  }
  0x23   :  { %88 = dma.done.wait [#allocation4], 256  }
  0x24   :  { %89 = vsyncadd [#allocation4], 4294967040 }
  0x25   :  { %38 = vsyncpa [#allocation3], 1 }
  0x26   :  { %39 = vsyncpa [#allocation4], 1 }

</bundles_post_ra>
